<compile_context>
chip_gen: v5e
topology: v5e:2x2
jax: 0.10.0
libtpu: 0.0.40
codegen_flags: <defaults>
</compile_context>

<pallas_src>
import functools
import math

import jax
import jax.numpy as jnp
from jax.experimental import pallas as pl
from jax.experimental.pallas import tpu as pltpu


def _round_up(x, m):
    return ((x + m - 1) // m) * m


def _vmem_limit_bytes():
    """Scoped-VMEM limit: ~75% of physical capacity (96 MiB on v5e/v6e, 48 MiB on v7x)."""
    try:
        cap = int(pltpu.get_tpu_info().vmem_capacity_bytes)
    except Exception:  # pragma: no cover - conservative fallback
        cap = 64 << 20
    if cap <= 0:
        cap = 64 << 20
    return max(32 << 20, (cap * 3) // 4)


def _pick_bb(B, T, Sp, Hp, budget_bytes):
    """Largest batch-block whose pipeline buffers + in-kernel temporaries fit.

    Preference order: even grid-step count >= 2 (keeps both v7x TCs balanced),
    then any step count >= 2, then whatever fits.  Within the preferred pool,
    take the largest bb (fewer grid steps, larger DMA tiles, larger MXU M-dim).
    """
    def footprint(bb):
        # double-buffered pipeline block buffers
        blk_in = (bb * T * Hp * 2          # tgt embeddings   bf16
                  + bb * Sp * Hp * 2       # memory bank      bf16
                  + 2 * bb * Sp * 4        # length/copy mask f32
                  + 2 * Hp * Hp * 2        # stacked weight   bf16
                  + Hp * 4)                # bias             f32
        blk_out = bb * T * Hp * 4 + 2 * bb * T * Sp * 4
        pipeline = 2 * (blk_in + blk_out)
        # in-kernel live temporaries (single copies, conservative)
        tmp = (3 * bb * T * Hp * 4         # q, ctx, proj            f32
               + 2 * bb * T * Hp * 2       # q_bf, scaled query      bf16
               + bb * T * 2 * Hp * 2       # cat                     bf16
               + 5 * bb * T * Sp * 4       # scores/e/attn/ce/cattn  f32
               + bb * Sp * Hp * 2)         # layout slack on mem     bf16
        return pipeline + tmp

    divisors = [d for d in range(1, B + 1) if B % d == 0]
    fitting = [d for d in divisors if footprint(d) <= budget_bytes] or [1]
    even_steps = [d for d in fitting if (B // d) >= 2 and (B // d) % 2 == 0]
    multi_steps = [d for d in fitting if (B // d) >= 2]
    pool = even_steps or multi_steps or fitting
    return max(pool)


# -----------------------------------------------------------------------------
# Fused kernel: MeanEncoder state + masked scaled-dot attention + copy attention
# + output projection, for BB batch elements per grid step.
# -----------------------------------------------------------------------------
def nmt_fused_kernel(tgt_ref, mem_ref, mask_ref, cmask_ref, w_ref, b_ref,
                     out_ref, attn_ref, cattn_ref, *, scale):
    # tgt_ref:   (BB, T, Hp)   bf16  embedded tgt[:-1] (H zero-padded to Hp)
    # mem_ref:   (BB, Sp, Hp)  bf16  memory bank = embedded src (zero-padded)
    # mask_ref:  (BB, 1, Sp)   f32   1.0 where position < length
    # cmask_ref: (BB, 1, Sp)   f32   1.0 where copyable AND valid
    # w_ref:     (2*Hp, Hp)    bf16  stacked [W_ctx; W_q] (zero-padded)
    # b_ref:     (1, 1, Hp)    f32   bias
    # out_ref:   (BB, T, Hp)   f32 ; attn_ref/cattn_ref: (BB, T, Sp) f32
    mem = mem_ref[...]
    mask = mask_ref[...]
    cmask = cmask_ref[...]
    neg = jnp.float32(-1e9)

    # ---- fused MeanEncoder: enc_state = (mask @ mem) / count (MXU, no XLU) ----
    total = jnp.einsum('bks,bsh->bkh', mask.astype(mem.dtype), mem,
                       preferred_element_type=jnp.float32)            # (BB,1,Hp)
    count = jnp.maximum(jnp.sum(mask, axis=-1, keepdims=True), 1.0)   # guard len==0
    enc_state = total / count                                         # exact; tiny tensor

    # ---- decoder.init_state: queries = tgt embedding + enc_state -------------
    q = tgt_ref[...].astype(jnp.float32) + enc_state                  # (BB,T,Hp) f32
    q_bf = q.astype(mem.dtype)                                        # for [ctx, q]
    qs_bf = (q * scale).astype(mem.dtype)                             # 1/sqrt(H) folded here

    # ---- scaled-dot attention scores (bf16 MXU, f32 accumulate) ---------------
    scores = jnp.einsum('bth,bsh->bts', qs_bf, mem,
                        preferred_element_type=jnp.float32)           # (BB,T,Sp)

    # ---- standard attention (length-masked softmax, f32) ----------------------
    s_std = scores + (1.0 - mask) * neg
    mx = jnp.max(s_std, axis=-1, keepdims=True)
    e = jnp.exp(s_std - mx)
    attn = e * pl.reciprocal(jnp.sum(e, axis=-1, keepdims=True), approx=True)
    attn_ref[...] = attn

    # ---- copy attention: reuse the std exp, re-mask, renormalize --------------
    ce = e * cmask                                                     # zero outside copyable
    cden = jnp.maximum(jnp.sum(ce, axis=-1, keepdims=True), jnp.float32(1e-20))
    cattn_ref[...] = ce * pl.reciprocal(cden, approx=True)

    # ---- context + fused flat output projection: tanh([ctx,q] @ [Wc;Wq] + b) ---
    ctx = jnp.einsum('bts,bsh->bth', attn.astype(mem.dtype), mem,
                     preferred_element_type=jnp.float32)              # (BB,T,Hp)
    cat = jnp.concatenate([ctx.astype(mem.dtype), q_bf], axis=-1)     # (BB,T,2Hp)
    bb, t, two_hp = cat.shape
    proj = jnp.dot(cat.reshape(bb * t, two_hp), w_ref[...],
                   preferred_element_type=jnp.float32)                # (bb*T, Hp)
    out_ref[...] = jnp.tanh(proj.reshape(bb, t, -1) + b_ref[...])


# -----------------------------------------------------------------------------
# pallas_call wrapper
# -----------------------------------------------------------------------------
def run_nmt_fused(tgt_emb, mem, len_mask, copy_mask, w_cat, bias,
                  *, h_real, bb, vmem_limit):
    B, T, Hp = tgt_emb.shape
    Sp = mem.shape[1]
    kernel = functools.partial(nmt_fused_kernel, scale=1.0 / math.sqrt(float(h_real)))
    out_shapes = (
        jax.ShapeDtypeStruct((B, T, Hp), jnp.float32),   # dec_out (padded H)
        jax.ShapeDtypeStruct((B, T, Sp), jnp.float32),   # std attention (padded S)
        jax.ShapeDtypeStruct((B, T, Sp), jnp.float32),   # copy attention (padded S)
    )
    # advisory cost estimate: helps XLA overlap the surrounding gathers/transposes
    flops = (2 * B * 1 * Sp * Hp             # encoder masked mean
             + 2 * B * T * Sp * Hp           # scores
             + 2 * B * T * Sp * Hp           # context
             + 2 * B * T * (2 * Hp) * Hp)    # output projection
    transcendentals = B * T * Sp + B * T * Hp
    bytes_accessed = (tgt_emb.size * 2 + mem.size * 2
                      + len_mask.size * 4 + copy_mask.size * 4
                      + w_cat.size * 2 + bias.size * 4
                      + B * T * Hp * 4 + 2 * B * T * Sp * 4)
    return pl.pallas_call(
        kernel,
        out_shape=out_shapes,
        grid=(B // bb,),
        in_specs=[
            pl.BlockSpec((bb, T, Hp), lambda i: (i, 0, 0)),    # tgt embeddings
            pl.BlockSpec((bb, Sp, Hp), lambda i: (i, 0, 0)),   # memory bank
            pl.BlockSpec((bb, 1, Sp), lambda i: (i, 0, 0)),    # length mask
            pl.BlockSpec((bb, 1, Sp), lambda i: (i, 0, 0)),    # copy mask
            pl.BlockSpec((2 * Hp, Hp), lambda i: (0, 0)),      # [W_ctx; W_q] (constant block)
            pl.BlockSpec((1, 1, Hp), lambda i: (0, 0, 0)),     # bias (constant block)
        ],
        out_specs=(
            pl.BlockSpec((bb, T, Hp), lambda i: (i, 0, 0)),
            pl.BlockSpec((bb, T, Sp), lambda i: (i, 0, 0)),
            pl.BlockSpec((bb, T, Sp), lambda i: (i, 0, 0)),
        ),
        compiler_params=pltpu.CompilerParams(
            dimension_semantics=("parallel",),
            vmem_limit_bytes=vmem_limit),
        cost_estimate=pl.CostEstimate(
            flops=flops,
            transcendentals=transcendentals,
            bytes_accessed=bytes_accessed),
    )(tgt_emb, mem, len_mask, copy_mask, w_cat, bias)


class NMTModelPallas:
    """NMTModel.forward(src, tgt, lengths) with a fused Pallas TPU hot path."""

    def __init__(self, vocab_src, vocab_tgt, hidden, key):
        k1, k2, k3, k4, k5 = jax.random.split(key, 5)
        scale = 0.02
        self.src_emb = scale * jax.random.normal(k1, (vocab_src, hidden), jnp.float32)
        self.tgt_emb = scale * jax.random.normal(k2, (vocab_tgt, hidden), jnp.float32)
        self.w_ctx = scale * jax.random.normal(k3, (hidden, hidden), jnp.float32)
        self.w_q = scale * jax.random.normal(k4, (hidden, hidden), jnp.float32)
        self.b_out = scale * jax.random.normal(k5, (1, hidden), jnp.float32)
        self.hidden = hidden

    def forward(self, src, tgt, lengths, bptt=False):
        # src: (S, B, 3) int32 ; tgt: (T+1, B) int32 ; lengths: (B,) int32
        S, B, _ = src.shape
        H = self.hidden

        # --- NMTModel.forward glue ---
        tgt = tgt[:-1]                                    # (T, B)
        T = tgt.shape[0]
        copy_mask_sb = src[:, :, 2]                       # (S, B)

        # padding: S only to the sublane multiple (8); H lane-dense (128) so the
        # main dec_out store is unmasked.  attn outputs are tiny -> masked stores
        # at small S are cheaper than 16x-padded softmax/score work.
        Sp = _round_up(S, 8)
        Hp = _round_up(H, 128)

        # --- encoder inputs (embed in XLA, masked mean fused in the kernel) ---
        src_tok = src[:, :, 0]                                        # (S, B)
        src_emb = jnp.take(self.src_emb, src_tok, axis=0)             # (S, B, H)
        mem_bsh = jnp.transpose(src_emb, (1, 0, 2)).astype(jnp.bfloat16)
        mem_bsh = jnp.pad(mem_bsh, ((0, 0), (0, Sp - S), (0, Hp - H)))

        len_mask = (jnp.arange(S)[None, :] < lengths[:, None]).astype(jnp.float32)
        copy_mask = (jnp.transpose(copy_mask_sb, (1, 0)) != 0).astype(jnp.float32)
        copy_mask = copy_mask * len_mask                              # copyable AND valid

        len_mask_p = jnp.pad(len_mask, ((0, 0), (0, Sp - S))).reshape(B, 1, Sp)
        copy_mask_p = jnp.pad(copy_mask, ((0, 0), (0, Sp - S))).reshape(B, 1, Sp)

        # --- decoder inputs ---
        tgt_emb = jnp.take(self.tgt_emb, tgt, axis=0)                 # (T, B, H)
        tgt_bth = jnp.transpose(tgt_emb, (1, 0, 2)).astype(jnp.bfloat16)
        tgt_bth = jnp.pad(tgt_bth, ((0, 0), (0, 0), (0, Hp - H)))

        # pre-stacked output-projection weight [W_ctx; W_q], each padded to Hp
        w_ctx_p = jnp.pad(self.w_ctx, ((0, Hp - H), (0, Hp - H)))
        w_q_p = jnp.pad(self.w_q, ((0, Hp - H), (0, Hp - H)))
        w_cat = jnp.concatenate([w_ctx_p, w_q_p], axis=0).astype(jnp.bfloat16)
        bias_p = jnp.pad(self.b_out, ((0, 0), (0, Hp - H))).reshape(1, 1, Hp)

        vmem_limit = _vmem_limit_bytes()
        bb = _pick_bb(B, T, Sp, Hp, budget_bytes=(vmem_limit * 3) // 4)

        dec_bth, attn_bts, cattn_bts = run_nmt_fused(
            tgt_bth, mem_bsh, len_mask_p, copy_mask_p, w_cat, bias_p,
            h_real=H, bb=bb, vmem_limit=vmem_limit)

        # strip padding, back to time-major (PyTorch contract)
        dec_out = jnp.transpose(dec_bth[:, :, :H], (1, 0, 2))         # (T, B, H)
        attns = {
            "std": jnp.transpose(attn_bts[:, :, :S], (1, 0, 2)),      # (T, B, S)
            "copy": jnp.transpose(cattn_bts[:, :, :S], (1, 0, 2)),    # (T, B, S)
        }
        return dec_out, attns


if __name__ == "__main__":
    key = jax.random.PRNGKey(0)
    k_src, k_feat, k_tgt, k_cpy, k_model = jax.random.split(key, 5)

    S, B, T_PLUS_1, H = 8, 4, 9, 32
    V_SRC, V_TGT = 50, 40

    src_tok = jax.random.randint(k_src, (S, B, 1), 0, V_SRC, dtype=jnp.int32)
    src_feat = jax.random.randint(k_feat, (S, B, 1), 0, 5, dtype=jnp.int32)
    src_copy = jax.random.randint(k_cpy, (S, B, 1), 0, 2, dtype=jnp.int32)
    src = jnp.concatenate([src_tok, src_feat, src_copy], axis=2)      # (S, B, 3)

    tgt = jax.random.randint(k_tgt, (T_PLUS_1, B), 0, V_TGT, dtype=jnp.int32)
    lengths = jnp.array([S, S - 3, S, S - 5], dtype=jnp.int32)        # (B,)

    model = NMTModelPallas(V_SRC, V_TGT, H, k_model)
    dec_out, attns = model.forward(src, tgt, lengths)

    jax.block_until_ready(dec_out)
    jax.block_until_ready(attns["std"])
    jax.block_until_ready(attns["copy"])

    assert dec_out.shape == (T_PLUS_1 - 1, B, H)
    assert attns["std"].shape == (T_PLUS_1 - 1, B, S)
    assert attns["copy"].shape == (T_PLUS_1 - 1, B, S)
    assert bool(jnp.all(jnp.isfinite(dec_out)))
    assert bool(jnp.all(jnp.isfinite(attns["std"])))
    assert bool(jnp.all(jnp.isfinite(attns["copy"])))
    # attention rows should (approximately) normalize over the valid prefix
    row_sums = jnp.sum(attns["std"], axis=-1)
    assert bool(jnp.all(jnp.abs(row_sums - 1.0) < 1e-2))

    print("KERNEL_OK")
</pallas_src>

<mosaic_0001>
module attributes {stable_mosaic.version = 11 : i64} {
  func.func @nmt_fused_kernel(%arg0: i32, %arg1: memref<2x8x128xbf16, #tpu.memory_space<vmem>>, %arg2: memref<2x8x128xbf16, #tpu.memory_space<vmem>>, %arg3: memref<2x1x8xf32, #tpu.memory_space<vmem>>, %arg4: memref<2x1x8xf32, #tpu.memory_space<vmem>>, %arg5: memref<256x128xbf16, #tpu.memory_space<vmem>>, %arg6: memref<1x1x128xf32, #tpu.memory_space<vmem>>, %arg7: memref<2x8x128xf32, #tpu.memory_space<vmem>>, %arg8: memref<2x8x8xf32, #tpu.memory_space<vmem>>, %arg9: memref<2x8x8xf32, #tpu.memory_space<vmem>>) attributes {dimension_semantics = [#tpu.dimension_semantics<parallel>], iteration_bounds = array<i64: 2>, scalar_prefetch = 0 : i64, scratch_operands = 0 : i64, tpu.core_type = #tpu.core_type<tc>, window_params = [{transform_indices = @transform_0, window_bounds = array<i64: 2, 8, 128>}, {transform_indices = @transform_1, window_bounds = array<i64: 2, 8, 128>}, {transform_indices = @transform_2, window_bounds = array<i64: 2, 1, 8>}, {transform_indices = @transform_3, window_bounds = array<i64: 2, 1, 8>}, {pipeline_mode = #tpu.pipeline_mode<synchronous>, transform_indices = @transform_4, window_bounds = array<i64: 256, 128>}, {pipeline_mode = #tpu.pipeline_mode<synchronous>, transform_indices = @transform_5, window_bounds = array<i64: 1, 1, 128>}, {transform_indices = @transform_6, window_bounds = array<i64: 2, 8, 128>}, {transform_indices = @transform_7, window_bounds = array<i64: 2, 8, 8>}, {transform_indices = @transform_8, window_bounds = array<i64: 2, 8, 8>}]} {
    %c0 = arith.constant 0 : index
    %c0_0 = arith.constant 0 : index
    %c0_1 = arith.constant 0 : index
    %0 = vector.load %arg2[%c0, %c0_0, %c0_1] : memref<2x8x128xbf16, #tpu.memory_space<vmem>>, vector<2x8x128xbf16>
    %c0_2 = arith.constant 0 : index
    %c0_3 = arith.constant 0 : index
    %c0_4 = arith.constant 0 : index
    %1 = vector.load %arg3[%c0_2, %c0_3, %c0_4] : memref<2x1x8xf32, #tpu.memory_space<vmem>>, vector<2x1x8xf32>
    %c0_5 = arith.constant 0 : index
    %c0_6 = arith.constant 0 : index
    %c0_7 = arith.constant 0 : index
    %2 = vector.load %arg4[%c0_5, %c0_6, %c0_7] : memref<2x1x8xf32, #tpu.memory_space<vmem>>, vector<2x1x8xf32>
    %3 = arith.truncf %1 : vector<2x1x8xf32> to vector<2x1x8xbf16>
    "tpu.trace_start"() <{level = 10 : i32, message = "bks,bsh->bkh"}> : () -> ()
    %cst = arith.constant dense<0.000000e+00> : vector<2x1x128xf32>
    %4 = tpu.matmul %3, %0, %cst {dimension_numbers = #tpu.dot_dimension_numbers<[2], [1], [1], [2], [0, 0, 0, 1, 1, 2], [0], [0]>} : vector<2x1x8xbf16>, vector<2x8x128xbf16>, vector<2x1x128xf32> -> vector<2x1x128xf32>
    "tpu.trace_stop"() : () -> ()
    %cst_8 = arith.constant dense<0.000000e+00> : vector<2x1xf32>
    %5 = vector.multi_reduction <add>, %1, %cst_8 [2] : vector<2x1x8xf32> to vector<2x1xf32>
    %6 = vector.shape_cast %5 : vector<2x1xf32> to vector<2x1x1xf32>
    %cst_9 = arith.constant 1.000000e+00 : f32
    %7 = vector.broadcast %cst_9 : f32 to vector<2x1x1xf32>
    %8 = arith.maximumf %6, %7 : vector<2x1x1xf32>
    %9 = vector.broadcast %8 : vector<2x1x1xf32> to vector<2x1x128xf32>
    %10 = arith.divf %4, %9 : vector<2x1x128xf32>
    %c0_10 = arith.constant 0 : index
    %c0_11 = arith.constant 0 : index
    %c0_12 = arith.constant 0 : index
    %11 = vector.load %arg1[%c0_10, %c0_11, %c0_12] : memref<2x8x128xbf16, #tpu.memory_space<vmem>>, vector<2x8x128xbf16>
    %12 = arith.extf %11 : vector<2x8x128xbf16> to vector<2x8x128xf32>
    %13 = vector.broadcast %10 : vector<2x1x128xf32> to vector<2x8x128xf32>
    %14 = arith.addf %12, %13 : vector<2x8x128xf32>
    %15 = arith.truncf %14 : vector<2x8x128xf32> to vector<2x8x128xbf16>
    %cst_13 = arith.constant 0.176776692 : f32
    %16 = vector.broadcast %cst_13 : f32 to vector<2x8x128xf32>
    %17 = arith.mulf %14, %16 : vector<2x8x128xf32>
    %18 = arith.truncf %17 : vector<2x8x128xf32> to vector<2x8x128xbf16>
    "tpu.trace_start"() <{level = 10 : i32, message = "bth,bsh->bts"}> : () -> ()
    %cst_14 = arith.constant dense<0.000000e+00> : vector<2x8x8xf32>
    %19 = tpu.matmul %18, %0, %cst_14 {dimension_numbers = #tpu.dot_dimension_numbers<[2], [2], [1], [1], [0, 0, 0, 1, 1, 1], [0], [0]>} : vector<2x8x128xbf16>, vector<2x8x128xbf16>, vector<2x8x8xf32> -> vector<2x8x8xf32>
    "tpu.trace_stop"() : () -> ()
    %cst_15 = arith.constant 1.000000e+00 : f32
    %20 = vector.broadcast %cst_15 : f32 to vector<2x1x8xf32>
    %21 = arith.subf %20, %1 : vector<2x1x8xf32>
    %cst_16 = arith.constant -1.000000e+09 : f32
    %22 = vector.broadcast %cst_16 : f32 to vector<2x1x8xf32>
    %23 = arith.mulf %21, %22 : vector<2x1x8xf32>
    %24 = vector.broadcast %23 : vector<2x1x8xf32> to vector<2x8x8xf32>
    %25 = arith.addf %19, %24 : vector<2x8x8xf32>
    %cst_17 = arith.constant dense<0xFF800000> : vector<2x8xf32>
    %26 = vector.multi_reduction <maximumf>, %25, %cst_17 [2] : vector<2x8x8xf32> to vector<2x8xf32>
    %27 = vector.shape_cast %26 : vector<2x8xf32> to vector<2x8x1xf32>
    %28 = vector.broadcast %27 : vector<2x8x1xf32> to vector<2x8x8xf32>
    %29 = arith.subf %25, %28 : vector<2x8x8xf32>
    %30 = math.exp %29 : vector<2x8x8xf32>
    %cst_18 = arith.constant dense<0.000000e+00> : vector<2x8xf32>
    %31 = vector.multi_reduction <add>, %30, %cst_18 [2] : vector<2x8x8xf32> to vector<2x8xf32>
    %32 = vector.shape_cast %31 : vector<2x8xf32> to vector<2x8x1xf32>
    %33 = tpu.reciprocal %32 {approx = true} : vector<2x8x1xf32> -> vector<2x8x1xf32>
    %34 = vector.broadcast %33 : vector<2x8x1xf32> to vector<2x8x8xf32>
    %35 = arith.mulf %30, %34 : vector<2x8x8xf32>
    %c0_19 = arith.constant 0 : index
    %c0_20 = arith.constant 0 : index
    %c0_21 = arith.constant 0 : index
    %36 = vector.load %arg8[%c0_19, %c0_20, %c0_21] : memref<2x8x8xf32, #tpu.memory_space<vmem>>, vector<2x8x8xf32>
    tpu.vector_store %arg8[%c0_19, %c0_20, %c0_21], %35 {strides = array<i32>} : memref<2x8x8xf32, #tpu.memory_space<vmem>>, vector<2x8x8xf32>,
    %37 = vector.broadcast %2 : vector<2x1x8xf32> to vector<2x8x8xf32>
    %38 = arith.mulf %30, %37 : vector<2x8x8xf32>
    %cst_22 = arith.constant dense<0.000000e+00> : vector<2x8xf32>
    %39 = vector.multi_reduction <add>, %38, %cst_22 [2] : vector<2x8x8xf32> to vector<2x8xf32>
    %40 = vector.shape_cast %39 : vector<2x8xf32> to vector<2x8x1xf32>
    %cst_23 = arith.constant 9.99999968E-21 : f32
    %41 = vector.broadcast %cst_23 : f32 to vector<2x8x1xf32>
    %42 = arith.maximumf %40, %41 : vector<2x8x1xf32>
    %43 = tpu.reciprocal %42 {approx = true} : vector<2x8x1xf32> -> vector<2x8x1xf32>
    %44 = vector.broadcast %43 : vector<2x8x1xf32> to vector<2x8x8xf32>
    %45 = arith.mulf %38, %44 : vector<2x8x8xf32>
    %c0_24 = arith.constant 0 : index
    %c0_25 = arith.constant 0 : index
    %c0_26 = arith.constant 0 : index
    %46 = vector.load %arg9[%c0_24, %c0_25, %c0_26] : memref<2x8x8xf32, #tpu.memory_space<vmem>>, vector<2x8x8xf32>
    tpu.vector_store %arg9[%c0_24, %c0_25, %c0_26], %45 {strides = array<i32>} : memref<2x8x8xf32, #tpu.memory_space<vmem>>, vector<2x8x8xf32>,
    %47 = arith.truncf %35 : vector<2x8x8xf32> to vector<2x8x8xbf16>
    "tpu.trace_start"() <{level = 10 : i32, message = "bts,bsh->bth"}> : () -> ()
    %cst_27 = arith.constant dense<0.000000e+00> : vector<2x8x128xf32>
    %48 = tpu.matmul %47, %0, %cst_27 {dimension_numbers = #tpu.dot_dimension_numbers<[2], [1], [1], [2], [0, 0, 0, 1, 1, 2], [0], [0]>} : vector<2x8x8xbf16>, vector<2x8x128xbf16>, vector<2x8x128xf32> -> vector<2x8x128xf32>
    "tpu.trace_stop"() : () -> ()
    %49 = arith.truncf %48 : vector<2x8x128xf32> to vector<2x8x128xbf16>
    %50 = tpu.concatenate %49, %15 in 2 : vector<2x8x128xbf16>, vector<2x8x128xbf16> -> vector<2x8x256xbf16>
    %51 = vector.shape_cast %50 : vector<2x8x256xbf16> to vector<16x256xbf16>
    %c0_28 = arith.constant 0 : index
    %c0_29 = arith.constant 0 : index
    %52 = vector.load %arg5[%c0_28, %c0_29] : memref<256x128xbf16, #tpu.memory_space<vmem>>, vector<256x128xbf16>
    %cst_30 = arith.constant dense<0.000000e+00> : vector<16x128xf32>
    %53 = tpu.matmul %51, %52, %cst_30 {dimension_numbers = #tpu.dot_dimension_numbers<[1], [0], [0], [1], [0, 0, 1, 1], [], []>} : vector<16x256xbf16>, vector<256x128xbf16>, vector<16x128xf32> -> vector<16x128xf32>
    %54 = vector.shape_cast %53 : vector<16x128xf32> to vector<2x8x128xf32>
    %c0_31 = arith.constant 0 : index
    %c0_32 = arith.constant 0 : index
    %c0_33 = arith.constant 0 : index
    %55 = vector.load %arg6[%c0_31, %c0_32, %c0_33] : memref<1x1x128xf32, #tpu.memory_space<vmem>>, vector<1x1x128xf32>
    %56 = vector.broadcast %55 : vector<1x1x128xf32> to vector<2x8x128xf32>
    %57 = arith.addf %54, %56 : vector<2x8x128xf32>
    %58 = math.tanh %57 : vector<2x8x128xf32>
    %c0_34 = arith.constant 0 : index
    %c0_35 = arith.constant 0 : index
    %c0_36 = arith.constant 0 : index
    %59 = vector.load %arg7[%c0_34, %c0_35, %c0_36] : memref<2x8x128xf32, #tpu.memory_space<vmem>>, vector<2x8x128xf32>
    tpu.vector_store %arg7[%c0_34, %c0_35, %c0_36], %58 {strides = array<i32>} : memref<2x8x128xf32, #tpu.memory_space<vmem>>, vector<2x8x128xf32>,
    return
  }
  func.func @transform_0(%arg0: i32) -> (i32, i32, i32) {
    %c0_i32 = arith.constant 0 : i32
    %c0_i32_0 = arith.constant 0 : i32
    %c0_i32_1 = arith.constant 0 : i32
    return %arg0, %c0_i32, %c0_i32_0 : i32, i32, i32
  }
  func.func @transform_1(%arg0: i32) -> (i32, i32, i32) {
    %c0_i32 = arith.constant 0 : i32
    %c0_i32_0 = arith.constant 0 : i32
    %c0_i32_1 = arith.constant 0 : i32
    return %arg0, %c0_i32, %c0_i32_0 : i32, i32, i32
  }
  func.func @transform_2(%arg0: i32) -> (i32, i32, i32) {
    %c0_i32 = arith.constant 0 : i32
    %c0_i32_0 = arith.constant 0 : i32
    %c0_i32_1 = arith.constant 0 : i32
    return %arg0, %c0_i32, %c0_i32_0 : i32, i32, i32
  }
  func.func @transform_3(%arg0: i32) -> (i32, i32, i32) {
    %c0_i32 = arith.constant 0 : i32
    %c0_i32_0 = arith.constant 0 : i32
    %c0_i32_1 = arith.constant 0 : i32
    return %arg0, %c0_i32, %c0_i32_0 : i32, i32, i32
  }
  func.func @transform_4(%arg0: i32) -> (i32, i32) {
    %c0_i32 = arith.constant 0 : i32
    %c0_i32_0 = arith.constant 0 : i32
    %c0_i32_1 = arith.constant 0 : i32
    return %c0_i32, %c0_i32_0 : i32, i32
  }
  func.func @transform_5(%arg0: i32) -> (i32, i32, i32) {
    %c0_i32 = arith.constant 0 : i32
    %c0_i32_0 = arith.constant 0 : i32
    %c0_i32_1 = arith.constant 0 : i32
    %c0_i32_2 = arith.constant 0 : i32
    return %c0_i32, %c0_i32_0, %c0_i32_1 : i32, i32, i32
  }
  func.func @transform_6(%arg0: i32) -> (i32, i32, i32) {
    %c0_i32 = arith.constant 0 : i32
    %c0_i32_0 = arith.constant 0 : i32
    %c0_i32_1 = arith.constant 0 : i32
    return %arg0, %c0_i32, %c0_i32_0 : i32, i32, i32
  }
  func.func @transform_7(%arg0: i32) -> (i32, i32, i32) {
    %c0_i32 = arith.constant 0 : i32
    %c0_i32_0 = arith.constant 0 : i32
    %c0_i32_1 = arith.constant 0 : i32
    return %arg0, %c0_i32, %c0_i32_0 : i32, i32, i32
  }
  func.func @transform_8(%arg0: i32) -> (i32, i32, i32) {
    %c0_i32 = arith.constant 0 : i32
    %c0_i32_0 = arith.constant 0 : i32
    %c0_i32_1 = arith.constant 0 : i32
    return %arg0, %c0_i32, %c0_i32_0 : i32, i32, i32
  }
}

</mosaic_0001>

<bundles_post_ra>
// kernel: tpu_custom_call.1
= control target key start
LH: loop header
LB: loop body
LE: loop exit
PB: predicated region body
PF: predicated region fallthrough
CT: control target
= control target key end

     0   :  { %s2069_s0 = inlined_call_operand.hbm [shape: bf16[4,8,128], index: 0, kind: input, shape index: {}]   ;;  %s2070_s1 = inlined_call_operand.hbm [shape: bf16[4,8,128], index: 1, kind: input, shape index: {}]   ;;  %s2071_s2 = inlined_call_operand.hbm [shape: f32[4,1,8], index: 2, kind: input, shape index: {}]   ;;  %s2072_s3 = inlined_call_operand.hbm [shape: f32[4,1,8], index: 3, kind: input, shape index: {}]   ;;  %s2073_s4 = inlined_call_operand.hbm [shape: bf16[256,128], index: 4, kind: input, shape index: {}]   ;;  %s2074_s5 = inlined_call_operand.vmem [shape: f32[1,1,128], index: 5, kind: input, shape index: {}]   ;;  %s2075_s6 = inlined_call_operand.hbm [shape: f32[4,8,128], index: 6, kind: output, shape index: {0}]   ;;  %s2076_s7 = inlined_call_operand.hbm [shape: f32[4,8,8], index: 7, kind: output, shape index: {1}]   ;;  %s2077_s8 = inlined_call_operand.hbm [shape: f32[4,8,8], index: 8, kind: output, shape index: {2}]  }
   0x1   :  { %2091 = sst [smem:[#allocation26_spill]] %s2070_s1 }
   0x2   :  { %2092 = sst [smem:[#allocation27_spill]] %s2073_s4 }
   0x3   :  { %2093 = sst [smem:[#allocation28_spill]] %s2075_s6 }
   0x4   :  { %14 = vsyncpa [#allocation3], 0 }
   0x5   :  { %16 = vsyncpa [#allocation3 + $0x1], 0 }
   0x6   :  { %17 = vsyncpa [#allocation6], 0 }
   0x7   :  { %19 = vsyncpa [#allocation6 + $0x1], 0 }
   0x8   :  { %20 = vsyncpa [#allocation9], 0 }
   0x9   :  { %22 = vsyncpa [#allocation9 + $0x1], 0 }
   0xa   :  { %23 = vsyncpa [#allocation4], 0 }
   0xb   :  { %25 = vsyncpa [#allocation4 + $0x1], 0 }
   0xc   :  { %26 = vsyncpa [#allocation13], 0 }
   0xd   :  { %28 = vsyncpa [#allocation13 + $0x1], 0  ;;  %s1737_s27 = smov 0   ;;  %s1739_s28 = smov 0  }
   0xe   :  { %s1741_s29 = smov 0   ;;  %s1743_s30 = smov 0  }
   0xf LB: > { %2094 = sst [smem:[#allocation21_spill]] %s1671_s27  ;;  %s1758_s9 = sadd.s32 4294967295, %s1683_s30   ;;  %s1683_s30 = sphi %s1743_s30, %s2115_s30   ;;  %s1679_s29 = sphi %s1741_s29, %s2117_s29   ;;  %s1675_s28 = sphi %s1739_s28, %s2119_s28   ;;  %s1671_s27 = sphi %s1737_s27, %s2118_s27  }
  0x10   : > { %2095 = sst [smem:[#allocation22_spill]] %s1679_s29  ;;  %s2078_s10 = sadd.s32 4294967294, %s1683_s30  }
  0x11   : > { %p54_p0 = scmp.ne.s32.totalorder %s1675_s28, %s1671_s27  ;;  %p55_p1 = scmp.eq.s32.totalorder %s1758_s9, 0 }
  0x12   : > { %p198_p2 = scmp.eq.s32.totalorder %s1758_s9, 1  ;;  %p204_p3 = scmp.eq.s32.totalorder %s2078_s10, 1 }
  0x13   : > { %p1769_p4 = por %p55_p1, %p54_p0  ;;  %p1158_p5 = scmp.ge.s32.totalorder %s1683_s30, 1 }
  0x14   : > { %p1774_p6 = por %p204_p3, %p54_p0  ;;  %p263_p7 = scmp.lt.s32.totalorder %s1683_s30, 3 }
  0x15   : > { %s2099_s4 = sld [smem:[#allocation27_spill]]  ;;  %s1685_s17 = smov [#allocation10]  }
  0x16   : > { %s2097_s12 = scalar_select %p1774_p6, 1, 0 }
  0x17   : > { %p1782_p8 = pnand %p1158_p5, %p263_p7  ;;  %s276_s18 = sshll.u32 %s1685_s17, 4  ;;  %s277_s18 = int_to_ptr.vmem [resolvable:$true] %s276_s18 }
  0x18   : > { %2098 = sst [smem:[#allocation23_spill]] %s2097_s12  ;;  %s1792_s19 = sadd.s32 1, %s1683_s30  }
  0x19   : > { %p1302_p9 = pneg %p1782_p8  ;;  %2101 = sst [smem:[#allocation24_spill]] %s1792_s19 }
  0x1a   : > { %s2079_s20 = smov 64   ;;  %s2081_s21 = smov 4  }
  0x1b   : > { %s274_s15 = sshll.u32 %s2099_s4, 4  ;;  %p1303_p10 = pnand %p1302_p9, %p55_p1  ;;  %s275_s15 = int_to_ptr.hbm [resolvable:$true] %s274_s15 }
  0x1c   : > { %s38_s22 = ssub.s32 %s1683_s30, %s1792_s19  ;;  %s41_s23 = sadd.s32 1, %s1679_s29 }
  0x1d   : > { %1305 = dma.hbm_to_vmem [thread:$0]  (!%p1303_p10), %s275_s15, 2048, %s277_s18, [#allocation9], %s2079_s20, %s2079_s20, %s2081_s21  }
  0x1e   : > { %p39_p12 = scmp.eq.s32.totalorder %s38_s22, 0  ;;  %p48_p13 = scmp.ne.s32.totalorder %s1679_s29, %s1675_s28 }
  0x1f   : > { %p49_p0 = scmp.eq.s32.totalorder %s1683_s30, 0  ;;  %p1330_p3 = scmp.lt.s32.totalorder %s1683_s30, 2 }
  0x20   : > { %s1805_s24 = scalar_select %p39_p12, %s1679_s29, %s41_s23  }
  0x21   : > { %p50_p5 = por %p49_p0, %p48_p13  ;;  %p1809_p7 = por %p198_p2, %p48_p13 }
  0x22   : > { %2102 = sst [smem:[#allocation25_spill]] %s1805_s24  ;;  %s1814_s26 = sand.u32 1, %s1679_s29  }
  0x23   : > { %s2084_s13 = sshll.u32 %s1683_s30, 3  ;;  %s1161_s14 = sshll.u32 %s1814_s26, 3 }
  0x24   : > { %p1818_p9 = pnand %p1330_p3, %p50_p5  ;;  %s2085_s17 = sand.u32 1, %s1683_s30  }
  0x25   : > { %s2105_s1 = sld [smem:[#allocation26_spill]]  ;;  %s319_s10 = scalar_lea.vmem [#allocation5], %s1161_s14 }
  0x26   : > { %s327_s20 = sshll.u32 %s319_s10, 4  ;;  %s1830_s4 = scalar_lea.sflag [#allocation6], %s2085_s17  ;;  %s328_s20 = int_to_ptr.vmem [resolvable:$true] %s327_s20 }
  0x27   : > { %p1429_p10 = pneg %p1818_p9 }
  0x2b   : > { %s324_s23 = scalar_lea.hbm %s2105_s1, %s2084_s13  ;;  %s1432_s10 = scalar_lea.hbm %s2105_s1, 16 }
  0x2c   : > { %s325_s21 = sshll.u32 %s324_s23, 4  ;;  %s326_s21 = int_to_ptr.hbm [resolvable:$true] %s325_s21 }
  0x2d   : > { %s1425_s24 = sshra.s32 %s326_s21, 4  ;;  %s1426_s24 = int_to_ptr.hbm [resolvable:$true] %s1425_s24 }
  0x2e   : > { %s1427_s29 = scalar_lea.hbm %s1426_s24, 8  ;;  %p1433_p0 = scmp.lt.s32.totalorder %s1426_s24, %s2105_s1 }
  0x2f   : > { %p1428_p2 = scmp.ne.s32.totalorder %s1426_s24, %s1427_s29  ;;  %p1434_p3 = scmp.lt.s32.totalorder %s1432_s10, %s1427_s29 }
  0x31   : > { %p1430_p12 = pnand %p1429_p10, %p1428_p2  ;;  %p1435_p5 = por %p1434_p3, %p1433_p0 }
  0x33   : > { %p1431_p13 = pneg %p1430_p12 }
  0x35   : > { %p1436_p11 = pnand %p1435_p5, %p1431_p13 }
  0x37   : > { %1439 = shalt.err (!%p1436_p11)
}
  0x38   : > { %s2106_s17 = smov 4   ;;  %s2107_s19 = smov 64  }
  0x39   : > { %1312 = dma.hbm_to_vmem [thread:$0]  (!%p1818_p9), %s326_s21, 128, %s328_s20, %s1830_s4, %s2107_s19, %s2107_s19, %s2106_s17  }
  0x3a   : > { %s2108_s18 = sshll.u32 %s1683_s30, 3  ;;  %s297_s29 = scalar_lea.vmem [#allocation2], %s1161_s14 }
  0x3b   : > { %s302_s24 = scalar_lea.hbm %s2069_s0, %s2108_s18  ;;  %s305_s13 = sshll.u32 %s297_s29, 4  ;;  %s306_s13 = int_to_ptr.vmem [resolvable:$true] %s305_s13 }
  0x3c   : > { %s303_s10 = sshll.u32 %s302_s24, 4  ;;  %s1167_s23 = sshll.u32 %s1814_s26, 1  ;;  %s304_s10 = int_to_ptr.hbm [resolvable:$true] %s303_s10 }
  0x3d   : > { %s294_s1 = scalar_lea.sflag [#allocation3], %s1814_s26  ;;  %s1455_s27 = sshra.s32 %s304_s10, 4  ;;  %s1456_s27 = int_to_ptr.hbm [resolvable:$true] %s1455_s27 }
  0x3e   : > { %s1457_s6 = scalar_lea.hbm %s1456_s27, 8  ;;  %s1462_s12 = scalar_lea.hbm %s2069_s0, 16 }
  0x3f   : > { %p1458_p11 = scmp.ne.s32.totalorder %s1456_s27, %s1457_s6  ;;  %p1463_p13 = scmp.lt.s32.totalorder %s1456_s27, %s2069_s0 }
  0x40   : > { %p1464_p0 = scmp.lt.s32.totalorder %s1462_s12, %s1457_s6 }
  0x41   : > { %p1460_p2 = pnand %p1458_p11, %p1429_p10 }
  0x42   : > { %p1465_p3 = por %p1464_p0, %p1463_p13 }
  0x43   : > { %p1461_p12 = pneg %p1460_p2 }
  0x45   : > { %p1466_p5 = pnand %p1465_p3, %p1461_p12 }
  0x47   : > { %1469 = shalt.err (!%p1466_p5)
}
  0x48   : > { %1309 = dma.hbm_to_vmem [thread:$0]  (!%p1818_p9), %s304_s10, 128, %s306_s13, %s294_s1, %s2107_s19, %s2107_s19, %s2106_s17  }
  0x49   : > { %s1168_s22 = sshll.u32 %s1683_s30, 1  ;;  %s341_s27 = scalar_lea.vmem [#allocation7], %s1167_s23 }
  0x4a   : > { %s345_s20 = scalar_lea.hbm %s2071_s2, %s1168_s22  ;;  %s348_s6 = sshll.u32 %s341_s27, 4  ;;  %s349_s6 = int_to_ptr.vmem [resolvable:$true] %s348_s6 }
  0x4b   : > { %s346_s21 = sshll.u32 %s345_s20, 4  ;;  %s1492_s17 = scalar_lea.hbm %s2071_s2, 4  ;;  %s347_s21 = int_to_ptr.hbm [resolvable:$true] %s346_s21 }
  0x4c   : > { %s1485_s12 = sshra.s32 %s347_s21, 4  ;;  %s1486_s12 = int_to_ptr.hbm [resolvable:$true] %s1485_s12 }
  0x4d   : > { %s1487_s18 = scalar_lea.hbm %s1486_s12, 2  ;;  %p1493_p13 = scmp.lt.s32.totalorder %s1486_s12, %s2071_s2 }
  0x4e   : > { %p1488_p11 = scmp.ne.s32.totalorder %s1486_s12, %s1487_s18  ;;  %p1494_p0 = scmp.lt.s32.totalorder %s1492_s17, %s1487_s18 }
  0x50   : > { %p1490_p2 = pnand %p1488_p11, %p1429_p10  ;;  %p1495_p3 = por %p1494_p0, %p1493_p13 }
  0x52   : > { %p1491_p12 = pneg %p1490_p2 }
  0x54   : > { %p1496_p5 = pnand %p1495_p3, %p1491_p12 }
  0x56   : > { %1499 = shalt.err (!%p1496_p5)
}
  0x57   : > { %s1688_s14 = smov 16   ;;  %s1689_s24 = smov 1  }
  0x58   : > { %1315 = dma.hbm_to_vmem [thread:$0]  (!%p1818_p9), %s347_s21, 32, %s349_s6, %s1830_s4, %s1688_s14, %s1688_s14, %s1689_s24  }
  0x59   : > { %s366_s27 = scalar_lea.hbm %s2072_s3, %s1168_s22  ;;  %s362_s1 = scalar_lea.vmem [#allocation8], %s1167_s23 }
  0x5a   : > { %s369_s12 = sshll.u32 %s362_s1, 4  ;;  %s367_s18 = sshll.u32 %s366_s27, 4  ;;  %s370_s12 = int_to_ptr.vmem [resolvable:$true] %s369_s12  ;;  %s368_s18 = int_to_ptr.hbm [resolvable:$true] %s367_s18 }
  0x5b   : > { %s2109_s19 = sand.u32 1, %s1683_s30   ;;  %s1515_s13 = sshra.s32 %s368_s18, 4  ;;  %s1516_s13 = int_to_ptr.hbm [resolvable:$true] %s1515_s13 }
  0x5c   : > { %s359_s17 = scalar_lea.sflag [#allocation9], %s2109_s19  ;;  %s1517_s10 = scalar_lea.hbm %s1516_s13, 2 }
  0x5d   : > { %p1518_p11 = scmp.ne.s32.totalorder %s1516_s13, %s1517_s10  ;;  %s1522_s22 = scalar_lea.hbm %s2072_s3, 4 }
  0x5e   : > { %p1523_p13 = scmp.lt.s32.totalorder %s1516_s13, %s2072_s3  ;;  %p1524_p0 = scmp.lt.s32.totalorder %s1522_s22, %s1517_s10 }
  0x5f   : > { %p1520_p2 = pnand %p1518_p11, %p1429_p10 }
  0x60   : > { %p1525_p3 = por %p1524_p0, %p1523_p13 }
  0x61   : > { %p1521_p12 = pneg %p1520_p2 }
  0x63   : > { %p1526_p5 = pnand %p1525_p3, %p1521_p12 }
  0x65   : > { %1529 = shalt.err (!%p1526_p5)
}
  0x66   : > { %1318 = dma.hbm_to_vmem [thread:$0]  (!%p1818_p9), %s368_s18, 32, %s370_s12, %s359_s17, %s1688_s14, %s1688_s14, %s1689_s24  }
  0x67   : > { %381 = sbr.rel (%p1782_p8) target bundleno = 942 (0x3ae), region = 44  ;;  %s1909_s21 = sand.u32 (!%p1782_p8), 1, %s1675_s28  }
  0x68   : > { %s1172_s29 = sshll.u32 (!%p1782_p8), %s1909_s21, 3  ;;  %s384_s20 = scalar_lea.sflag (!%p1782_p8), [#allocation3], %s1909_s21 }
  0x69   : > { %s1913_s27 = scalar_lea.vmem (!%p1782_p8), [#allocation2], %s1172_s29 }
  0x6c   : > { %1646 = dma.done.wait (%p1769_p4), %s384_s20, 128  }
  0x6d   : > { %1648 = vsyncadd (%p1769_p4), %s384_s20, 4294967168  ;;  %s1920_s15 = sand.u32 1, %s1758_s9   ;;  %s397_s14 = scalar_lea.vmem [#allocation5], %s1172_s29 }
  0x6e   : > { %s394_s16 = scalar_lea.sflag [#allocation6], %s1920_s15 }
  0x6f   : > { %1650 = dma.done.wait (%p1769_p4), %s394_s16, 160  }
  0x70   : > { %1652 = vsyncadd (%p1769_p4), %s394_s16, 4294967136  ;;  %s1174_s24 = sshll.u32 %s1909_s21, 1  ;;  %s414_s12 = scalar_lea.sflag [#allocation9], %s1920_s15 }
  0x71   : > { %s407_s1 = scalar_lea.vmem [#allocation7], %s1174_s24  ;;  %s1929_s18 = scalar_lea.vmem [#allocation8], %s1174_s24 }
  0x72   : > { %1654 = dma.done.wait (%p1769_p4), %s414_s12, 32  }
  0x73   : > { %1656 = vsyncadd (%p1769_p4), %s414_s12, 4294967264 }
  0x74   : > { %1658 = dma.done.wait (%p55_p1), [#allocation9], 2048  }
  0x75   : > { %1660 = vsyncadd (%p55_p1), [#allocation9], 4294965248  ;;  %vm537_vm0 = vcmask 57344   ;;  %vm501_vm1 = vcmask 1043456   ;;  %v1939_v0 = vld [vmem:[%s407_s1] sm:$0x1] }
  0x76   : > { %v489_v1 = vld [vmem:[%s397_s14] sm:$0xf]  ;;  %v490_v2 = vld [vmem:[%s397_s14 + $0x4] sm:$0xf]  ;;  %v538_v3 = vsel %vm537_vm0, %v1939_v0, 0.0  ;;  %v495_v5 = vpack.c.bf16 %v1939_v0, %v1939_v0  ;;  %vm497_vm2 = vcmask 64512  }
  0x77   : > { %v503_v4 = vsel %vm501_vm1, %v489_v1, 0  ;;  %v522_v6 = vsel %vm501_vm1, %v490_v2, 0  ;;  %v1945_v7 = vld [vmem:[%s407_s1 + $0x1] sm:$0x1]  ;;  %539 = vadd.xlane.f32.xlu0 %v538_v3  ;;  %v1275_v11 = vld [vmem:[#allocation10 + $0x70] sm:$0xff]  ;;  %v1274_v12 = vld [vmem:[#allocation10 + $0x68] sm:$0xff] }
  0x78   : > { %512 = vmatpush.bf16.msra.mxu0 %v503_v4  ;;  %v496_v8 = vpack.c.bf16 %v1945_v7, %v1945_v7  ;;  %531 = vmatpush.bf16.msra.mxu1 %v522_v6  ;;  %v541_v9 = vsel %vm537_vm0, %v1945_v7, 0.0  ;;  %v1276_v10 = vld [vmem:[#allocation10 + $0x78] sm:$0xff]  ;;  %v1273_v13 = vld [vmem:[#allocation10 + $0x60] sm:$0xff]  ;;  %v1271_v15 = vld [vmem:[#allocation10 + $0x50] sm:$0xff]  ;;  %s1965_s11 = sshll.u32 %s1909_s21, 4  ;;  %s1984_s13 = sshll.u32 %s1758_s9, 4 }
  0x79   : > { %862 = vmatpush.bf16.msra.mxu3 %v1276_v10  ;;  %v1272_v14 = vld [vmem:[#allocation10 + $0x58] sm:$0xff]  ;;  %v1270_v16 = vld [vmem:[#allocation10 + $0x48] sm:$0xff]  ;;  %v1269_v19 = vld [vmem:[#allocation10 + $0x40] sm:$0xff]  ;;  %s1968_s19 = scalar_lea.vmem [#allocation12], %s1965_s11  ;;  %s1974_s17 = scalar_lea.vmem [#allocation14], %s1965_s11 }
  0x7a   : > { %v1281_v33 = vld [vmem:[%s1913_s27] sm:$0xff]   ;;  %s925_s6 = scalar_lea.hbm %s2076_s7, %s1984_s13  ;;  %s926_s22 = sshll.u32 %s1968_s19, 4  ;;  %s927_s22 = int_to_ptr.vmem [resolvable:$true] %s926_s22 }
  0x7b   : > { %1180 = vmatmul.msk.bf16.vlgmr.msra.gmra.mxu0 %vm497_vm2, %v495_v5  ;;  %1181 = vmatmul.msk.bf16.vlgmr.msra.gmra.mxu1 %vm497_vm2, %v496_v8  ;;  %v1282_v38 = vunpack.c.l.bf16 %v1281_v33  ;;  %v1283_v53 = vunpack.c.h.bf16 %v1281_v33  ;;  %s928_s26 = sshll.u32 %s925_s6, 4  ;;  %s892_s23 = scalar_lea.sflag [#allocation13], %s1920_s15  ;;  %s929_s26 = int_to_ptr.hbm [resolvable:$true] %s928_s26 }
  0x7c   : > { %607 = vmatpush.bf16.xpose.msrb.mxu0 %v489_v1  ;;  %620 = vmatpush.bf16.xpose.msrb.mxu1 %v490_v2  ;;  %v590_v1 = vsub.f32 1.0, %v1939_v0  ;;  %s1559_s29 = sshra.s32 %s929_s26, 4  ;;  %s1565_s16 = scalar_lea.hbm %s2076_s7, 32  ;;  %s1560_s29 = int_to_ptr.hbm [resolvable:$true] %s1559_s29 }
  0x7d   : > { %863 = vmatpush.bf16.msra.mxu3 %v1275_v11  ;;  %s1561_s20 = scalar_lea.hbm %s1560_s29, 16  ;;  %p1566_p9 = scmp.lt.s32.totalorder %s1560_s29, %s2076_s7 }
  0x7e   : > { %v592_v2 = vmul.f32 -1e+09, %v590_v1  ;;  %p1562_p1 = scmp.ne.s32.totalorder %s1560_s29, %s1561_s20  ;;  %p1567_p10 = scmp.lt.s32.totalorder %s1565_s16, %s1561_s20 }
  0x7f   : > { %542 = vadd.xlane.f32.xlu0 %v541_v9 }
  0x80   : > { %v596_v3 = vperm.slane %v592_v2, 0  ;;  %p1563_p4 = pnand %p1562_p1, %p1809_p7  ;;  %p1568_p11 = por %p1567_p10, %p1566_p9 }
  0x81   : > { %864 = vmatpush.bf16.msra.mxu3 %v1274_v12 }
  0x82   : > { %p1564_p8 = pneg %p1563_p4 }
  0x84   : > { %684 = vmatpush.bf16.msra.mxu0 %v503_v4  ;;  %700 = vmatpush.bf16.msra.mxu1 %v522_v6  ;;  %v591_v4 = vsub.f32 1.0, %v1945_v7  ;;  %p1569_p2 = pnand %p1568_p11, %p1564_p8 }
  0x85   : > { %865 = vmatpush.bf16.msra.mxu3 %v1273_v13 }
  0x86   : > { %v593_v8 = vmul.f32 -1e+09, %v591_v4 }
  0x88   : > { %v597_v10 = vperm.slane %v593_v8, 0 }
  0x89   : > { %866 = vmatpush.bf16.msra.mxu3 %v1272_v14 }
  0x8d   : > { %867 = vmatpush.bf16.msra.mxu3 %v1271_v15 }
  0x91   : > { %868 = vmatpush.bf16.msra.mxu3 %v1270_v16 }
  0x95   : > { %869 = vmatpush.bf16.msra.mxu3 %v1269_v19 }
  0xea   : > { %v540_v17 = vpop.xlane.xlu0 %539 }
  0xeb   : > { %v544_v18 = vmax.f32 %v540_v17, 1.0 }
  0xed   : > { %1375 = vrcp.f32 %v544_v18  ;;  %v557_v26 = vand.u32 2147483648, %v544_v18  ;;  %v555_v28 = vand.u32 2147483647, %v544_v18  ;;  %vm551_vm4 = vweird.f32 %v544_v18 }
  0xef   : > { %v558_v32 = vor.u32 1.1754944e-38, %v557_v26  ;;  %vm556_vm6 = vcmp.eq.f32.partialorder %v555_v28, 8.507059e+37 }
  0xf2   : > { %v543_v20 = vpop.xlane.xlu0 %542 }
  0xf3   : > { %v1376_v21 = vpop.eup %1375  ;;  %v545_v22 = vmax.f32 %v543_v20, 1.0 }
  0xf4   : > { %v547_v23 = vmul.f32 %v1376_v21, %v544_v18  ;;  %vm552_vm3 = vweird.f32 %v1376_v21  ;;  %v1372_v18 = vld [vmem:[%s1929_s18] ss:$0 sm:$0xff] }
  0xf5   : > { %1377 = vrcp.f32 %v545_v22  ;;  %vm553_vm5 = vmor %vm551_vm4, %vm552_vm3  ;;  %v572_v40 = vand.u32 2147483648, %v545_v22  ;;  %v570_v44 = vand.u32 2147483647, %v545_v22  ;;  %vm566_vm8 = vweird.f32 %v545_v22 }
  0xf6   : > { %v548_v24 = vsub.f32 1.0, %v547_v23 }
  0xf7   : > { %v573_v48 = vor.u32 1.1754944e-38, %v572_v40  ;;  %vm571_vm10 = vcmp.eq.f32.partialorder %v570_v44, 8.507059e+37 }
  0xf8   : > { %v514_v25 = vpop.f32.mrf.mxu0  ;;  %v549_v27 = vmul.f32 %v1376_v21, %v548_v24  ;;  %v533_v29 = vpop.f32.mrf.mxu1 }
  0xfa   : > { %v550_v30 = vadd.f32 %v1376_v21, %v549_v27 }
  0xfb   : > { %v1378_v31 = vpop.eup %1377 }
  0xfc   : > { %v554_v34 = vsel %vm553_vm5, %v1376_v21, %v550_v30  ;;  %v562_v35 = vmul.f32 %v1378_v31, %v545_v22  ;;  %vm567_vm7 = vweird.f32 %v1378_v31  ;;  %v1268_v30 = vld [vmem:[#allocation10 + $0x38] sm:$0xff] }
  0xfd   : > { %v559_v36 = vsel %vm556_vm6, %v558_v32, %v554_v34  ;;  %vm568_vm9 = vmor %vm566_vm8, %vm567_vm7  ;;  %848 = vmatpush.bf16.msra.mxu2 %v1268_v30  ;;  %v1266_v32 = vld [vmem:[#allocation10 + $0x28] sm:$0xff]  ;;  %v1265_v34 = vld [vmem:[#allocation10 + $0x20] sm:$0xff] }
  0xfe   : > { %v560_v37 = vmul.f32 %v559_v36, %v514_v25  ;;  %v563_v39 = vsub.f32 1.0, %v562_v35  ;;  %v1373_v25 = vld [vmem:[%s1929_s18 + $0x1] ss:$0 sm:$0xff] }
 0x100   : > { %v516_v41 = vpop.f32.mrf.mxu0  ;;  %v580_v42 = vperm.slane %v560_v37, 0  ;;  %v564_v43 = vmul.f32 %v1378_v31, %v563_v39  ;;  %v535_v45 = vpop.f32.mrf.mxu1 }
 0x102   : > { %v582_v46 = vadd.f32 %v1282_v38, %v580_v42  ;;  %v565_v47 = vadd.f32 %v1378_v31, %v564_v43 }
 0x104   : > { %v569_v49 = vsel %vm568_vm9, %v1378_v31, %v565_v47  ;;  %v586_v50 = vmul.f32 0.17677669, %v582_v46  ;;  %v584_v57 = vpack.c.bf16 %v582_v46, %v582_v46  ;;  %v1267_v31 = vld [vmem:[#allocation10 + $0x30] sm:$0xff] }
 0x105   : > { %v574_v51 = vsel %vm571_vm10, %v573_v48, %v569_v49  ;;  %849 = vmatpush.bf16.msra.mxu2 %v1267_v31 }
 0x106   : > { %v575_v52 = vmul.f32 %v574_v51, %v533_v29  ;;  %v588_v54 = vpack.c.bf16 %v586_v50, %v586_v50  ;;  %v713_v61 = vunpack.c.l.b16 %v584_v57  ;;  %v1264_v50 = vld [vmem:[#allocation10 + $0x18] sm:$0xff]  ;;  %v1263_v51 = vld [vmem:[#allocation10 + $0x10] sm:$0xff] }
 0x108   : > { %v581_v55 = vperm.slane %v575_v52, 0  ;;  %608 = vmatmul.bf16.vlgmr.msrb.gmra.mxu0 %v588_v54  ;;  %v1262_v52 = vld [vmem:[#allocation10 + $0x8] sm:$0xff] }
 0x109   : > { %850 = vmatpush.bf16.msra.mxu2 %v1266_v32 }
 0x10a   : > { %v583_v56 = vadd.f32 %v1283_v53, %v581_v55  ;;  %v1261_v53 = vld [vmem:[#allocation10] sm:$0xff] }
 0x10c   : > { %v587_v58 = vmul.f32 0.17677669, %v583_v56  ;;  %v585_v59 = vpack.c.bf16 %v583_v56, %v583_v56 }
 0x10d   : > { %851 = vmatpush.bf16.msra.mxu2 %v1265_v34 }
 0x10e   : > { %v589_v60 = vpack.c.bf16 %v587_v58, %v587_v58  ;;  %v715_v62 = vunpack.c.l.b16 %v585_v59 }
 0x110   : > { %621 = vmatmul.bf16.vlgmr.msrb.gmra.mxu1 %v589_v60  ;;  %v749_v63 = vpack.c.b16 %v715_v62, %v713_v61 }
 0x111   : > { %852 = vmatpush.bf16.msra.mxu2 %v1264_v50 }
 0x112   : > { %870 = vmatmul.bf16.vlgmr.msra.gmra.mxu3 %v749_v63 }
 0x115   : > { %853 = vmatpush.bf16.msra.mxu2 %v1263_v51 }
 0x119   : > { %854 = vmatpush.bf16.msra.mxu2 %v1262_v52 }
 0x11d   : > { %855 = vmatpush.bf16.msra.mxu2 %v1261_v53 }
 0x185   : > { %v609_v5 = vpop.f32.mrf.mxu0 }
 0x186   : > { %v610_v6 = vadd.f32 %v609_v5, %v596_v3 }
 0x188   : > { %v626_v9 = vsel %vm497_vm2, %v610_v6, -inf }
 0x189   : > { %627 = vmax.xlane.f32.xlu1 %v626_v9 }
 0x18d   : > { %v611_v11 = vpop.f32.mrf.mxu0  ;;  %v622_v12 = vpop.f32.mrf.mxu1 }
 0x18e   : > { %v623_v13 = vadd.f32 %v622_v12, %v597_v10 }
 0x190   : > { %v629_v14 = vsel %vm497_vm2, %v623_v13, -inf }
 0x191   : > { %630 = vmax.xlane.f32.xlu1 %v629_v14 }
 0x195   : > { %v624_v15 = vpop.f32.mrf.mxu1 }
 0x1fc   : > { %v628_v0 = vpop.xlane.xlu1 %627 }
 0x1fd   : > { %v632_v16 = vsub.f32 %v610_v6, %v628_v0 }
 0x1ff   : > { %v634_v17 = vmul.f32 1.442695, %v632_v16 }
 0x201   : > { %1379 = vpow2.f32 %v634_v17 }
 0x204   : > { %v631_v7 = vpop.xlane.xlu1 %630 }
 0x205   : > { %v633_v19 = vsub.f32 %v623_v13, %v631_v7 }
 0x207   : > { %v1380_v20 = vpop.eup %1379  ;;  %v636_v21 = vmul.f32 1.442695, %v633_v19 }
 0x208   : > { %v638_v22 = vsel %vm497_vm2, %v1380_v20, 0.0  ;;  %v656_v23 = vmul.f32 %v1380_v20, %v1372_v18 }
 0x209   : > { %1381 = vpow2.f32 %v636_v21  ;;  %639 = vadd.xlane.f32.xlu2 %v638_v22 }
 0x20a   : > { %v658_v24 = vsel %vm497_vm2, %v656_v23, 0.0 }
 0x20b   : > { %659 = vadd.xlane.f32.xlu0 %v658_v24 }
 0x20f   : > { %v1382_v26 = vpop.eup %1381 }
 0x210   : > { %v641_v27 = vsel %vm497_vm2, %v1382_v26, 0.0  ;;  %v657_v28 = vmul.f32 %v1382_v26, %v1373_v25 }
 0x211   : > { %642 = vadd.xlane.f32.xlu2 %v641_v27 }
 0x212   : > { %v661_v29 = vsel %vm497_vm2, %v657_v28, 0.0 }
 0x213   : > { %662 = vadd.xlane.f32.xlu1 %v661_v29 }
 0x27c   : > { %v640_v33 = vpop.xlane.xlu2 %639 }
 0x27d   : > { %1383 = vrcp.f32 %v640_v33 }
 0x27e   : > { %v660_v35 = vpop.xlane.xlu0 %659 }
 0x27f   : > { %v664_v36 = vmax.f32 %v660_v35, 1e-20 }
 0x281   : > { %1385 = vrcp.f32 %v664_v36 }
 0x283   : > { %v1384_v37 = vpop.eup %1383 }
 0x284   : > { %v646_v38 = vmul.f32 %v1384_v37, %v1380_v20  ;;  %v643_v39 = vpop.xlane.xlu2 %642 }
 0x285   : > { %1387 = vrcp.f32 %v643_v39 }
 0x286   : > { %v672_v40 = vpack.c.bf16 %v646_v38, %v646_v38  ;;  %648 = vst.msk [vmem:[%s1968_s19] sm:$0xff] %vm497_vm2, %v646_v38  ;;  %v663_v41 = vpop.xlane.xlu1 %662 }
 0x287   : > { %v1386_v42 = vpop.eup %1385  ;;  %v665_v43 = vmax.f32 %v663_v41, 1e-20 }
 0x288   : > { %v668_v44 = vmul.f32 %v1386_v42, %v656_v23  ;;  %1182 = vmatmul.msk.bf16.vlgmr.msra.gmra.mxu0 %vm497_vm2, %v672_v40 }
 0x289   : > { %1389 = vrcp.f32 %v665_v43 }
 0x28a   : > { %670 = vst.msk [vmem:[%s1974_s17] sm:$0xff] %vm497_vm2, %v668_v44 }
 0x28b   : > { %v1388_v45 = vpop.eup %1387 }
 0x28c   : > { %v647_v46 = vmul.f32 %v1388_v45, %v1382_v26 }
 0x28e   : > { %649 = vst.msk [vmem:[%s1968_s19 + $0x8] sm:$0xff] %vm497_vm2, %v647_v46  ;;  %v673_v47 = vpack.c.bf16 %v647_v46, %v647_v46 }
 0x28f   : > { %v1390_v48 = vpop.eup %1389 }
 0x290   : > { %v669_v49 = vmul.f32 %v1390_v48, %v657_v28  ;;  %1183 = vmatmul.msk.bf16.vlgmr.msra.gmra.mxu1 %vm497_vm2, %v673_v47 }
 0x292   : > { %671 = vst.msk [vmem:[%s1974_s17 + $0x8] sm:$0xff] %vm497_vm2, %v669_v49 }
 0x305   : > { %v686_v54 = vpop.f32.mrf.mxu0 }
 0x306   : > { %v706_v55 = vpack.c.bf16 %v686_v54, %v686_v54 }
 0x308   : > { %v712_v59 = vunpack.c.l.b16 %v706_v55 }
 0x30d   : > { %v688_v56 = vpop.f32.mrf.mxu0  ;;  %v702_v57 = vpop.f32.mrf.mxu1 }
 0x30e   : > { %v707_v58 = vpack.c.bf16 %v702_v57, %v702_v57 }
 0x310   : > { %v714_v60 = vunpack.c.l.b16 %v707_v58 }
 0x312   : > { %v748_v61 = vpack.c.b16 %v714_v60, %v712_v59 }
 0x314   : > { %856 = vmatmul.bf16.vlgmr.msra.gmra.mxu2 %v748_v61 }
 0x315   : > { %v704_v62 = vpop.f32.mrf.mxu1 }
 0x316   : > { %1572 = shalt.err (!%p1569_p2)
}
 0x317   : > { %s1690_s1 = smov 128   ;;  %s1691_s12 = smov 8  }
 0x318   : > { %1297 = dma.vmem_to_hbm [thread:$0]  (%p1809_p7), %s927_s22, 256, %s929_s26, %s892_s23, %s1690_s1, %s1690_s1, %s1691_s12  }
 0x319   : > { %s942_s10 = scalar_lea.hbm %s2077_s8, %s1984_s13  ;;  %s943_s4 = sshll.u32 %s1974_s17, 4  ;;  %s944_s4 = int_to_ptr.vmem [resolvable:$true] %s943_s4 }
 0x31a   : > { %s945_s6 = sshll.u32 %s942_s10, 4  ;;  %s1593_s16 = scalar_lea.hbm %s2077_s8, 32  ;;  %s946_s6 = int_to_ptr.hbm [resolvable:$true] %s945_s6 }
 0x31b   : > { %s1587_s29 = sshra.s32 %s946_s6, 4  ;;  %s1588_s29 = int_to_ptr.hbm [resolvable:$true] %s1587_s29 }
 0x31c   : > { %s1589_s20 = scalar_lea.hbm %s1588_s29, 16  ;;  %p1594_p3 = scmp.lt.s32.totalorder %s1588_s29, %s2077_s8 }
 0x31d   : > { %p1590_p12 = scmp.ne.s32.totalorder %s1588_s29, %s1589_s20  ;;  %p1595_p5 = scmp.lt.s32.totalorder %s1593_s16, %s1589_s20 }
 0x31f   : > { %p1591_p13 = pnand %p1590_p12, %p1809_p7  ;;  %p1596_p1 = por %p1595_p5, %p1594_p3 }
 0x321   : > { %p1592_p0 = pneg %p1591_p13 }
 0x323   : > { %p1597_p4 = pnand %p1596_p1, %p1592_p0 }
 0x325   : > { %1600 = shalt.err (!%p1597_p4)
}
 0x326   : > { %1298 = dma.vmem_to_hbm [thread:$0]  (%p1809_p7), %s944_s4, 256, %s946_s6, %s892_s23, %s1690_s1, %s1690_s1, %s1691_s12   ;;  %v871_v63 = vpop.f32.mrf.mxu3 }
 0x327   : > { %v1374_v1 = vld [vmem:[%s2074_s5] ss:$0 sm:$0xff]  ;;  %s466_s15 = scalar_lea.vmem [#allocation11], %s1965_s11  ;;  %s2110_s18 = sld [smem:[#allocation28_spill]] }
 0x328   : > { %s909_s10 = sshll.u32 %s466_s15, 4  ;;  %s887_s6 = scalar_lea.sflag [#allocation4], %s1909_s21  ;;  %s910_s10 = int_to_ptr.vmem [resolvable:$true] %s909_s10 }
 0x32d   : > { %s908_s19 = scalar_lea.hbm %s2110_s18, %s1984_s13  ;;  %s1621_s9 = scalar_lea.hbm %s2110_s18, 32 }
 0x32e   : > { %v873_v5 = vpop.f32.mrf.mxu3  ;;  %s911_s4 = sshll.u32 %s908_s19, 4  ;;  %s912_s4 = int_to_ptr.hbm [resolvable:$true] %s911_s4 }
 0x32f   : > { %s1615_s29 = sshra.s32 %s912_s4, 4  ;;  %s1616_s29 = int_to_ptr.hbm [resolvable:$true] %s1615_s29 }
 0x330   : > { %s1617_s20 = scalar_lea.hbm %s1616_s29, 16  ;;  %p1622_p11 = scmp.lt.s32.totalorder %s1616_s29, %s2110_s18 }
 0x331   : > { %p1618_p8 = scmp.ne.s32.totalorder %s1616_s29, %s1617_s20  ;;  %p1623_p2 = scmp.lt.s32.totalorder %s1621_s9, %s1617_s20 }
 0x333   : > { %p1619_p9 = pnand %p1618_p8, %p1809_p7  ;;  %p1624_p12 = por %p1623_p2, %p1622_p11 }
 0x335   : > { %p1620_p10 = pneg %p1619_p9 }
 0x337   : > { %p1625_p13 = pnand %p1624_p12, %p1620_p10 }
 0x397   : > { %v857_v2 = vpop.f32.mrf.mxu2 }
 0x398   : > { %v872_v3 = vadd.f32 %v871_v63, %v857_v2 }
 0x39a   : > { %v880_v4 = vadd.f32 %v1374_v1, %v872_v3 }
 0x39c   : > { %1391 = vtanh.f32 %v880_v4 }
 0x39f   : > { %v859_v6 = vpop.f32.mrf.mxu2 }
 0x3a0   : > { %v874_v8 = vadd.f32 %v873_v5, %v859_v6 }
 0x3a2   : > { %v1392_v9 = vpop.eup %1391  ;;  %v881_v10 = vadd.f32 %v1374_v1, %v874_v8 }
 0x3a3   : > { %884 = vst [vmem:[%s466_s15] sm:$0xff] %v1392_v9 }
 0x3a4   : > { %1393 = vtanh.f32 %v881_v10 }
 0x3aa   : > { %v1394_v11 = vpop.eup %1393 }
 0x3ab   : > { %885 = vst [vmem:[%s466_s15 + $0x8] sm:$0xff] %v1394_v11 }
 0x3ac   : > { %1628 = shalt.err (!%p1625_p13)
}
 0x3ad   : > { %1296 = dma.vmem_to_hbm [thread:$0]  (%p1809_p7), %s910_s10, 256, %s912_s4, %s887_s6, %s1690_s1, %s1690_s1, %s1691_s12  }
 0x3ae PF: > { %s2111_s21 = sld [smem:[#allocation21_spill]]  ;;  %p2113_p0 = scmp.ge.s32.totalorder %s1683_s30, 2 }
 0x3b0   : > { %p1320_p3 = pnand %p2113_p0, %p1774_p6 }
 0x3b2   : > { %p1321_p5 = pneg %p1320_p3 }
 0x3b4   : > { %s960_s26 = sand.u32 1, %s2111_s21  }
 0x3b5   : > { %s961_s17 = scalar_lea.sflag [#allocation4], %s960_s26 }
 0x3b6   : > { %1662 = dma.done.wait (%p1321_p5), %s961_s17, 256  }
 0x3b7   : > { %1664 = vsyncadd (%p1321_p5), %s961_s17, 4294967040  ;;  %s2114_s14 = sadd.s32 4294967294, %s1683_s30  }
 0x3b8   : > { %s970_s15 = sand.u32 1, %s2114_s14  }
 0x3b9   : > { %s971_s25 = scalar_lea.sflag [#allocation13], %s970_s15 }
 0x3ba   : > { %1666 = dma.done.wait (%p1321_p5), %s971_s25, 512  }
 0x3bb   : > { %1668 = vsyncadd (%p1321_p5), %s971_s25, 4294966784  ;;  %s2115_s30 = sld [smem:[#allocation24_spill]]  ;;  %s2118_s27 = smov %s1675_s28 }
 0x3bc   : > { %s2116_s1 = sld [smem:[#allocation22_spill]] }
 0x3bd   : > { %s2117_s29 = sld [smem:[#allocation25_spill]] }
 0x3c1   : > { %p31_p7 = scmp.ge.s32.totalorder %s2115_s30, 4  }
 0x3c2   : > { %s2119_s28 = smov %s2116_s1 }
 0x3c3   :  { %33 = sbr.rel (!%p31_p7) target bundleno = 15 (0xf), region = 162 }
 0x3c8   :  { %987 = vsyncpa [#allocation3], 1 }
 0x3c9   :  { %989 = vsyncpa [#allocation3 + $0x1], 1 }
 0x3ca   :  { %990 = vsyncpa [#allocation6], 1 }
 0x3cb   :  { %992 = vsyncpa [#allocation6 + $0x1], 1 }
 0x3cc   :  { %993 = vsyncpa [#allocation9], 1 }
 0x3cd   :  { %995 = vsyncpa [#allocation9 + $0x1], 1 }
 0x3ce   :  { %996 = vsyncpa [#allocation4], 1 }
 0x3cf   :  { %998 = vsyncpa [#allocation4 + $0x1], 1 }
 0x3d0   :  { %999 = vsyncpa [#allocation13], 1 }
 0x3d1   :  { %1001 = vsyncpa [#allocation13 + $0x1], 1 }

</bundles_post_ra>
